<compile_context>
chip_gen: v7x
topology: tpu7x:2x2x1
jax: 0.10.0
libtpu: 0.0.40
codegen_flags: <defaults>
</compile_context>

<pallas_src>
import functools
import math

import jax
import jax.numpy as jnp
from jax import lax
from jax.experimental import pallas as pl
from jax.experimental.pallas import tpu as pltpu


def _round_up(n, m):
    return -(-n // m) * m


def _pe_add_batch_major_kernel(coef_ref, x_ref, o_ref, *, block_rows):
    """x_ref: (B, ts, L) tile of the (B, S//fold, fold*D) view (batch_first=True).

    coef_ref is a tiny VMEM-resident (2, L) f32 table with
      coef[0, l] = fold * inv_freq[l % D]
      coef[1, l] = (l // D) * inv_freq[l % D] + (l % D % 2) * pi/2
    so pe[row, l] = sin(row * coef[0, l] + coef[1, l]) = sin(pos*inv_freq + phase)
    with pos = row*fold + l//D.  The sinusoid is evaluated ONCE per
    (seq, feature) element and broadcast (free, leading dim) over the batch.
    """
    _, ts, lane = x_ref.shape
    row0 = pl.program_id(0) * block_rows
    row = (row0 + lax.broadcasted_iota(jnp.int32, (ts, lane), 0)).astype(jnp.float32)
    a = coef_ref[0:1, :]                       # (1, lane)
    c = coef_ref[1:2, :]                       # (1, lane)
    pe = jnp.sin(row * a + c)                  # (ts, lane) f32, deduped across B
    o_ref[...] = (x_ref[...].astype(jnp.float32) + pe[None, :, :]).astype(o_ref.dtype)


def _pe_add_seq_major_kernel(coef_ref, x_ref, o_ref, *, block_rows):
    """x_ref: (ts, B, D) tile of the (S, B, D) input (batch_first=False).

    pe is computed on a (ts, 1, D) slab (pos depends only on the seq tile) and
    broadcast-added over the B sublanes, deduping the trig work across batch.
    """
    ts, _, d = x_ref.shape
    row0 = pl.program_id(0) * block_rows
    pos = (row0 + lax.broadcasted_iota(jnp.int32, (ts, 1, d), 0)).astype(jnp.float32)
    a = coef_ref[0:1]                          # (1, 1, d) inv_freq
    c = coef_ref[1:2]                          # (1, 1, d) phase
    pe = jnp.sin(pos * a + c)                  # (ts, 1, d) f32
    o_ref[...] = (x_ref[...].astype(jnp.float32) + pe).astype(o_ref.dtype)


def _pick_block_rows(n_rows, row_bytes, itemsize, *, target_bytes=2 << 20):
    """Seq rows per tile: ~target_bytes per padded VMEM buffer, sublane-aligned,
    and an even number of grid steps whenever we tile at all (v7x 2-TC split)."""
    sub = max(8, 32 // max(1, itemsize))
    if n_rows <= sub:
        return n_rows
    total = n_rows * row_bytes
    steps = max(1, -(-total // target_bytes))
    if steps > 1 and steps % 2:
        steps += 1                              # even grid -> both v7x cores get work
    rows = _round_up(-(-n_rows // steps), sub)
    return max(1, min(rows, n_rows))


def _sanitize_block_rows(block_rows, n_rows, sub):
    """Clamp & align a (possibly user-supplied) row tile to the (8,128) rules."""
    block_rows = int(max(1, min(block_rows, n_rows)))
    if block_rows >= n_rows:
        return n_rows
    block_rows = max(sub, (block_rows // sub) * sub)
    return min(block_rows, n_rows)


def base_positional_encodings(x, *, d_model=None, base=10000, batch_first=False,
                              block_rows=None, target_block_bytes=2 << 20):
    """JAX/Pallas equivalent of BasePositionalEncodings.forward.

    x: (S, B, D) if batch_first=False (PyTorch default), else (B, S, D).
    """
    assert x.ndim == 3, "expected a 3-D input"
    D = x.shape[-1]
    if d_model is None:
        d_model = D
    assert D == d_model, "last dim of x must equal d_model"
    assert D % 2 == 0, "d_model must be even (as in the PyTorch module)"

    itemsize = jnp.dtype(x.dtype).itemsize
    sub = max(8, 32 // itemsize)                # sublane packing for this dtype

    # Per-feature frequencies / phases (f32).  cos(a) is taken as sin(a + pi/2)
    # so the kernel evaluates one transcendental per pe element.
    j = jnp.arange(D, dtype=jnp.int32)
    inv_freq = jnp.exp(((j // 2) * 2).astype(jnp.float32)
                       * (-math.log(float(base)) / D))
    phase = (j % 2).astype(jnp.float32) * (math.pi / 2.0)

    if batch_first:
        B, S, _ = x.shape
        # Generalized lane folding: fold = 128 / gcd(D, 128) consecutive seq
        # positions packed into the lane dim -> store width a multiple of 128.
        fold = 128 // math.gcd(D, 128)
        if fold > 1 and S % fold != 0:
            fold = 1   # TODO(synk): pad S to a fold multiple instead of masked stores
        rows, lane = S // fold, D * fold
        xk = jnp.reshape(x, (B, rows, lane))          # free, contiguous reshape
        inv_f = jnp.tile(inv_freq, fold)
        a = float(fold) * inv_f                       # fold is a power of two -> exact
        c = ((jnp.arange(lane, dtype=jnp.int32) // D).astype(jnp.float32) * inv_f
             + jnp.tile(phase, fold))
        coef = jnp.stack([a, c])                      # (2, lane) f32, VMEM resident
        row_bytes = B * _round_up(lane, 128) * itemsize
        n_rows = rows
        kernel_fn = _pe_add_batch_major_kernel
        coef_spec = pl.BlockSpec((2, lane), lambda s: (0, 0))
        x_block = lambda br: (B, br, lane)
        x_map = lambda s: (0, s, 0)
        out_shape = jax.ShapeDtypeStruct((B, rows, lane), x.dtype)
        n_trans = rows * lane
    else:
        S, B, _ = x.shape
        xk = x
        coef = jnp.stack([inv_freq, phase]).reshape(2, 1, D)   # (2, 1, D) f32
        # Padded minor-tile footprint of one seq row in VMEM (sizes the tile).
        row_bytes = _round_up(B, sub) * _round_up(D, 128) * itemsize
        n_rows = S
        kernel_fn = _pe_add_seq_major_kernel
        coef_spec = pl.BlockSpec((2, 1, D), lambda s: (0, 0, 0))
        x_block = lambda br: (br, B, D)
        x_map = lambda s: (s, 0, 0)
        out_shape = jax.ShapeDtypeStruct((S, B, D), x.dtype)
        n_trans = S * D

    if block_rows is None:
        block_rows = _pick_block_rows(n_rows, row_bytes, itemsize,
                                      target_bytes=target_block_bytes)
    block_rows = _sanitize_block_rows(block_rows, n_rows, sub)
    grid = (pl.cdiv(n_rows, block_rows),)

    kernel = functools.partial(kernel_fn, block_rows=block_rows)

    cost = pl.CostEstimate(
        flops=4 * x.size,                      # pe mul+add, f32 add, cast
        transcendentals=n_trans,               # one (batch-deduped) sin per pe element
        bytes_accessed=2 * x.size * itemsize + coef.size * 4,
    )

    out = pl.pallas_call(
        kernel,
        out_shape=out_shape,
        grid_spec=pltpu.PrefetchScalarGridSpec(
            num_scalar_prefetch=0,
            grid=grid,
            in_specs=[coef_spec, pl.BlockSpec(x_block(block_rows), x_map)],
            out_specs=pl.BlockSpec(x_block(block_rows), x_map),
        ),
        compiler_params=pltpu.CompilerParams(
            dimension_semantics=("parallel",),
        ),
        input_output_aliases={1: 0},           # pure in-place add: reuse x's buffer
        cost_estimate=cost,
    )(coef, xk)

    return jnp.reshape(out, x.shape)


def _reference(x, *, d_model, base=10000, batch_first=False):
    """Pure-JAX port of the PyTorch forward for verification."""
    if not batch_first:
        x = jnp.transpose(x, (1, 0, 2))              # -> (B, S, D)
    B, S, D = x.shape
    seq_len = 2 * S
    position = jnp.arange(seq_len, dtype=jnp.float32)[:, None]
    div_term = jnp.exp(jnp.arange(0, D, 2, dtype=jnp.float32)
                       * (-math.log(base) / D))
    pe = jnp.zeros((seq_len, D), dtype=jnp.float32)
    pe = pe.at[:, 0::2].set(jnp.sin(position * div_term))
    pe = pe.at[:, 1::2].set(jnp.cos(position * div_term))
    pe = pe[None].transpose(1, 0, 2)                 # (seq_len, 1, D)
    x = x + jnp.transpose(pe[:S, :], (1, 0, 2))      # (B,S,D) + (1,S,D)
    if not batch_first:
        x = jnp.transpose(x, (1, 0, 2))              # back to (S, B, D)
    return x


if __name__ == "__main__":
    # (1) PyTorch default layout (S, B, D), small d_model -> seq-major dedup path.
    S, B, D = 8, 2, 32
    x = jax.random.normal(jax.random.PRNGKey(0), (S, B, D), dtype=jnp.float32)
    ref = _reference(x, d_model=D, base=10000, batch_first=False)
    out = jax.block_until_ready(
        base_positional_encodings(x, d_model=D, base=10000, batch_first=False))
    assert out.shape == x.shape and out.dtype == x.dtype
    assert jnp.allclose(out, ref, atol=1e-5, rtol=1e-5)

    # (2) batch_first=True, d_model < 128 -> lane-folded (128-wide store) path.
    xb = jax.random.normal(jax.random.PRNGKey(1), (B, S, D), dtype=jnp.float32)
    refb = _reference(xb, d_model=D, base=10000, batch_first=True)
    outb = jax.block_until_ready(
        base_positional_encodings(xb, d_model=D, base=10000, batch_first=True))
    assert jnp.allclose(outb, refb, atol=1e-5, rtol=1e-5)

    # (3) batch_first=False, wide d_model (multiple of 128), bf16, multi-step grid.
    S3, B3, D3 = 64, 4, 256
    xw = jax.random.normal(jax.random.PRNGKey(2), (S3, B3, D3),
                           dtype=jnp.float32).astype(jnp.bfloat16)
    refw = _reference(xw, d_model=D3, base=10000, batch_first=False)
    outw = jax.block_until_ready(
        base_positional_encodings(xw, d_model=D3, base=10000, batch_first=False,
                                  target_block_bytes=32 << 10))
    assert outw.shape == xw.shape and outw.dtype == jnp.bfloat16
    assert jnp.allclose(outw.astype(jnp.float32), refw.astype(jnp.float32),
                        atol=5e-2, rtol=5e-2)

    # (4) batch_first=True, d_model = 128 (fold = 1), multi-step even grid.
    S4, B4, D4 = 32, 2, 128
    xt = jax.random.normal(jax.random.PRNGKey(3), (B4, S4, D4), dtype=jnp.float32)
    reft = _reference(xt, d_model=D4, base=10000, batch_first=True)
    outt = jax.block_until_ready(
        base_positional_encodings(xt, d_model=D4, base=10000, batch_first=True,
                                  target_block_bytes=16 << 10))
    assert jnp.allclose(outt, reft, atol=1e-4, rtol=1e-5)

    print("KERNEL_OK")
</pallas_src>

<mosaic_0001>
module attributes {stable_mosaic.version = 11 : i64} {
  func.func @_pe_add_seq_major_kernel(%arg0: i32, %arg1: memref<2x1x32xf32, #tpu.memory_space<vmem>>, %arg2: memref<8x2x32xf32, #tpu.memory_space<vmem>>, %arg3: memref<8x2x32xf32, #tpu.memory_space<vmem>>) attributes {dimension_semantics = [#tpu.dimension_semantics<parallel>], iteration_bounds = array<i64: 1>, scalar_prefetch = 0 : i64, scratch_operands = 0 : i64, tpu.core_type = #tpu.core_type<tc>, window_params = [{pipeline_mode = #tpu.pipeline_mode<synchronous>, transform_indices = @transform_0, window_bounds = array<i64: 2, 1, 32>}, {transform_indices = @transform_1, window_bounds = array<i64: 8, 2, 32>}, {transform_indices = @transform_2, window_bounds = array<i64: 8, 2, 32>}]} {
    %c8_i32 = arith.constant 8 : i32
    %0 = arith.muli %arg0, %c8_i32 : i32
    %1 = tpu.iota {dimensions = array<i32: 0>} : vector<8x1x32xi32>
    %2 = vector.broadcast %0 : i32 to vector<8x1x32xi32>
    %3 = arith.addi %2, %1 : vector<8x1x32xi32>
    %4 = arith.sitofp %3 : vector<8x1x32xi32> to vector<8x1x32xf32>
    %c0 = arith.constant 0 : index
    %c0_0 = arith.constant 0 : index
    %c0_1 = arith.constant 0 : index
    %5 = vector.load %arg1[%c0, %c0_0, %c0_1] : memref<2x1x32xf32, #tpu.memory_space<vmem>>, vector<1x1x32xf32>
    %c1 = arith.constant 1 : index
    %c0_2 = arith.constant 0 : index
    %c0_3 = arith.constant 0 : index
    %6 = vector.load %arg1[%c1, %c0_2, %c0_3] : memref<2x1x32xf32, #tpu.memory_space<vmem>>, vector<1x1x32xf32>
    %7 = vector.broadcast %5 : vector<1x1x32xf32> to vector<8x1x32xf32>
    %8 = arith.mulf %4, %7 : vector<8x1x32xf32>
    %9 = vector.broadcast %6 : vector<1x1x32xf32> to vector<8x1x32xf32>
    %10 = arith.addf %8, %9 : vector<8x1x32xf32>
    %11 = math.sin %10 : vector<8x1x32xf32>
    %c0_4 = arith.constant 0 : index
    %c0_5 = arith.constant 0 : index
    %c0_6 = arith.constant 0 : index
    %12 = vector.load %arg2[%c0_4, %c0_5, %c0_6] : memref<8x2x32xf32, #tpu.memory_space<vmem>>, vector<8x2x32xf32>
    %13 = vector.broadcast %11 : vector<8x1x32xf32> to vector<8x2x32xf32>
    %14 = arith.addf %12, %13 : vector<8x2x32xf32>
    %c0_7 = arith.constant 0 : index
    %c0_8 = arith.constant 0 : index
    %c0_9 = arith.constant 0 : index
    %15 = vector.load %arg3[%c0_7, %c0_8, %c0_9] : memref<8x2x32xf32, #tpu.memory_space<vmem>>, vector<8x2x32xf32>
    tpu.vector_store %arg3[%c0_7, %c0_8, %c0_9], %14 {strides = array<i32>} : memref<8x2x32xf32, #tpu.memory_space<vmem>>, vector<8x2x32xf32>,
    return
  }
  func.func @transform_0(%arg0: i32) -> (i32, i32, i32) {
    %c0_i32 = arith.constant 0 : i32
    %c0_i32_0 = arith.constant 0 : i32
    %c0_i32_1 = arith.constant 0 : i32
    %c0_i32_2 = arith.constant 0 : i32
    return %c0_i32, %c0_i32_0, %c0_i32_1 : i32, i32, i32
  }
  func.func @transform_1(%arg0: i32) -> (i32, i32, i32) {
    %c0_i32 = arith.constant 0 : i32
    %c0_i32_0 = arith.constant 0 : i32
    %c0_i32_1 = arith.constant 0 : i32
    return %arg0, %c0_i32, %c0_i32_0 : i32, i32, i32
  }
  func.func @transform_2(%arg0: i32) -> (i32, i32, i32) {
    %c0_i32 = arith.constant 0 : i32
    %c0_i32_0 = arith.constant 0 : i32
    %c0_i32_1 = arith.constant 0 : i32
    return %arg0, %c0_i32, %c0_i32_0 : i32, i32, i32
  }
}

</mosaic_0001>

<bundles_post_ra>
// kernel: tpu_custom_call.1
= control target key start
LH: loop header
LB: loop body
LE: loop exit
PB: predicated region body
PF: predicated region fallthrough
CT: control target
= control target key end

     0   :  { %7 = vsyncpa [#allocation3], 0  ;;  %s1897_s0 = inlined_call_operand.vmem [shape: f32[2,1,32], index: 0, kind: input, shape index: {}]   ;;  %s1898_s1 = inlined_call_operand.hbm [shape: f32[8,2,32], index: 1, kind: input, shape index: {}, may-alias: {1,2}]   ;;  %s1899_s2 = inlined_call_operand.hbm [shape: f32[8,2,32], index: 2, kind: output, shape index: {}, may-alias: {1,2}]  }
   0x1   :  { %8 = vsyncpa [#allocation4], 0  ;;  %s1139_s9 = smov [#allocation2]   ;;  %s1091_s13 = scalar_lea.hbm %s1898_s1, 256 }
   0x2   :  { %s16_s10 = sshll.u32 %s1139_s9, 4  ;;  %p1092_p0 = scmp.ne.s32.totalorder %s1898_s1, %s1091_s13  ;;  %s17_s10 = int_to_ptr.vmem [resolvable:$true] %s16_s10 }
   0x3   :  { %p1095_p1 = scmp.lt.u32.totalorder %s1091_s13, %s1898_s1 }
   0x5   :  { %p1097_p2 = pnand %p1095_p1, %p1092_p0 }
   0x7   :  { %1100 = shalt.err (!%p1097_p2)
}
   0x8   :  { %s1101_s18 = scalar_lea.vmem %s17_s10, 256  ;;  %p1106_p4 = scmp.lt.s32.totalorder %s17_s10, %s17_s10 }
   0x9   :  { %p1102_p3 = scmp.ne.s32.totalorder %s17_s10, %s1101_s18  ;;  %p1107_p5 = scmp.lt.s32.totalorder %s1101_s18, %s1101_s18 }
   0xb   :  { %p1108_p6 = por %p1107_p5, %p1106_p4 }
   0xd   :  { %p1109_p7 = pnand %p1108_p6, %p1102_p3 }
   0xf   :  { %1112 = shalt.err (!%p1109_p7)
}
  0x10   :  { %s1140_s19 = smov 32   ;;  %s1141_s20 = smov 2  }
  0x11   :  { %22 = dma.hbm_to_vmem [thread:$0]  %s1898_s1, 256, %s17_s10, [#allocation3], %s1140_s19, %s1140_s19, %s1141_s20  }
  0x12   :  { %1135 = dma.done.wait [#allocation3], 256  }
  0x13   :  { %1136 = vsyncadd [#allocation3], 4294967040  ;;  %v1182_v0 = vld [vmem:[%s1897_s0] sm:$0x1]  ;;  %v1187_v1 = vld [vmem:[%s1897_s0 + $0x1] sm:$0x1] }
  0x14   :  { %v46_v2 = vmul.f32 0.0, %v1182_v0  ;;  %v48_v3 = vmul.f32 2.0, %v1182_v0  ;;  %v1193_v4 = vadd.f32 %v1187_v1, %v1182_v0  ;;  %v49_v17 = vmul.f32 3.0, %v1182_v0  ;;  %s1148_s0 = smov [#allocation5]  }
  0x15   :  { %v1142_v36 = vmov 683565275   ;;  %v1143_v38 = vmov 2475754826   ;;  %v1144_v40 = vmov 2131351028  }
  0x16   :  { %v1196_v5 = vadd.f32 %v1187_v1, %v46_v2  ;;  %v166_v6 = vand.u32 2147483647, %v1193_v4  ;;  %v1200_v7 = vadd.f32 %v1187_v1, %v48_v3  ;;  %v169_v10 = vand.u32 2139095040, %v1193_v4  ;;  %s972_s1 = sshll.u32 %s1148_s0, 4  ;;  %s973_s1 = int_to_ptr.vmem [resolvable:$true] %s972_s1 }
  0x17   :  { %v1212_v25 = vadd.f32 %v1187_v1, %v49_v17  ;;  %v1145_v42 = vmov 2102212464   ;;  %v1146_v44 = vmov 920167782   ;;  %v1147_v52 = vmov 1326507024   ;;  %p1118_p9 = scmp.lt.s32.totalorder %s973_s1, %s973_s1 }
  0x18   :  { %v62_v8 = vand.u32 2147483647, %v1196_v5  ;;  %v65_v9 = vand.u32 2139095040, %v1196_v5  ;;  %v170_v13 = vshrl.u32 %v169_v10, 23  ;;  %v173_v14 = vand.u32 8388607, %v166_v6 }
  0x19   :  { %v273_v16 = vand.u32 2139095040, %v1200_v7  ;;  %v270_v30 = vand.u32 2147483647, %v1200_v7  ;;  %s1113_s27 = scalar_lea.vmem %s973_s1, 256 }
  0x1a   :  { %v66_v11 = vshrl.u32 %v65_v9, 23  ;;  %v69_v12 = vand.u32 8388607, %v62_v8  ;;  %v989_v18 = vadd.s32 4294967169, %v170_v13  ;;  %v174_v22 = vor.u32 8388608, %v173_v14  ;;  %p1114_p8 = scmp.ne.s32.totalorder %s973_s1, %s1113_s27  ;;  %p1119_p10 = scmp.lt.s32.totalorder %s1113_s27, %s1113_s27 }
  0x1b   :  { %v274_v20 = vshrl.u32 %v273_v16, 23 }
  0x1c   :  { %v985_v15 = vadd.s32 4294967169, %v66_v11  ;;  %v70_v21 = vor.u32 8388608, %v69_v12  ;;  %v176_v23 = vadd.s32 1, %v989_v18  ;;  %v1217_v33 = vshll.u32 %v174_v22, 8  ;;  %p1120_p11 = por %p1119_p10, %p1118_p9 }
  0x1d   :  { %v993_v24 = vadd.s32 4294967169, %v274_v20 }
  0x1e   :  { %v72_v19 = vadd.s32 1, %v985_v15  ;;  %vm177_vm1 = vcmp.gt.s32.totalorder %v176_v23, 0  ;;  %v1215_v31 = vshll.u32 %v70_v21, 8  ;;  %p1121_p12 = pnand %p1120_p11, %p1114_p8 }
  0x1f   :  { %v178_v29 = vsel %vm177_vm1, %v176_v23, 0  ;;  %v1219_v34 = vadd.s32 1, %v993_v24 }
  0x20   :  { %vm73_vm0 = vcmp.gt.s32.totalorder %v72_v19, 0  ;;  %v180_v32 = vand.u32 31, %v178_v29  ;;  %v1226_v46 = vshrl.u32 %v178_v29, 5 }
  0x21   :  { %v74_v26 = vsel %vm73_vm0, %v72_v19, 0  ;;  %vm281_vm11 = vcmp.gt.s32.totalorder %v1219_v34, 0 }
  0x22   :  { %v75_v27 = vshrl.u32 %v74_v26, 5  ;;  %v76_v28 = vand.u32 31, %v74_v26  ;;  %v181_v57 = vsub.s32 32, %v180_v32  ;;  %v183_v60 = vshll.u32 %v1142_v36, %v180_v32 }
  0x23   :  { %v186_v11 = vshll.u32 %v1143_v38, %v180_v32  ;;  %vm198_vm6 = vcmp.lt.s32.totalorder %v1226_v46, 1  ;;  %vm199_vm7 = vcmp.lt.s32.totalorder %v1226_v46, 2  ;;  %vm200_vm9 = vcmp.lt.s32.totalorder %v1226_v46, 3 }
  0x24   :  { %v77_v35 = vsub.s32 32, %v76_v28  ;;  %v79_v37 = vshll.u32 %v1142_v36, %v76_v28  ;;  %v82_v39 = vshll.u32 %v1143_v38, %v76_v28  ;;  %v85_v41 = vshll.u32 %v1144_v40, %v76_v28 }
  0x25   :  { %v88_v43 = vshll.u32 %v1145_v42, %v76_v28  ;;  %v91_v45 = vshll.u32 %v1146_v44, %v76_v28  ;;  %vm94_vm2 = vcmp.lt.s32.totalorder %v75_v27, 1  ;;  %vm95_vm3 = vcmp.lt.s32.totalorder %v75_v27, 2 }
  0x26   :  { %v78_v47 = vshrl.u32 %v1142_v36, %v77_v35  ;;  %v80_v48 = vshrl.u32 %v1143_v38, %v77_v35  ;;  %v83_v49 = vshrl.u32 %v1144_v40, %v77_v35  ;;  %v86_v50 = vshrl.u32 %v1145_v42, %v77_v35 }
  0x27   :  { %v89_v51 = vshrl.u32 %v1146_v44, %v77_v35  ;;  %v92_v53 = vshrl.u32 %v1147_v52, %v77_v35  ;;  %vm97_vm4 = vcmp.lt.s32.totalorder %v75_v27, 4  ;;  %vm96_vm5 = vcmp.lt.s32.totalorder %v75_v27, 3 }
  0x28   :  { %v81_v54 = vor.u32 %v80_v48, %v79_v37  ;;  %v84_v55 = vor.u32 %v83_v49, %v82_v39  ;;  %v87_v56 = vor.u32 %v86_v50, %v85_v41  ;;  %v182_v14 = vshrl.u32 %v1142_v36, %v181_v57 }
  0x29   :  { %v90_v58 = vor.u32 %v89_v51, %v88_v43  ;;  %v93_v59 = vor.u32 %v92_v53, %v91_v45  ;;  %v184_v15 = vshrl.u32 %v1143_v38, %v181_v57  ;;  %v187_v19 = vshrl.u32 %v1144_v40, %v181_v57 }
  0x2a   :  { %v98_v61 = vsel %vm94_vm2, %v78_v47, %v81_v54  ;;  %v99_v62 = vsel %vm97_vm4, %v87_v56, 2102212464  ;;  %v102_v63 = vsel %vm94_vm2, %v81_v54, %v84_v55  ;;  %v106_v2 = vsel %vm94_vm2, %v84_v55, %v87_v56 }
  0x2b   :  { %v100_v3 = vsel %vm96_vm5, %v84_v55, %v99_v62  ;;  %v103_v9 = vsel %vm97_vm4, %v90_v58, 920167782  ;;  %v107_v10 = vsel %vm97_vm4, %v93_v59, 1326507024  ;;  %v185_v24 = vor.u32 %v184_v15, %v183_v60 }
  0x2c   :  { %v104_v12 = vsel %vm96_vm5, %v87_v56, %v103_v9  ;;  %v108_v13 = vsel %vm96_vm5, %v90_v58, %v107_v10  ;;  %v101_v16 = vsel %vm95_vm3, %v98_v61, %v100_v3  ;;  %v188_v26 = vor.u32 %v187_v19, %v186_v11 }
  0x2d   :  { %v105_v17 = vsel %vm95_vm3, %v102_v63, %v104_v12  ;;  %v109_v18 = vsel %vm95_vm3, %v106_v2, %v108_v13  ;;  %v189_v28 = vshll.u32 %v1144_v40, %v180_v32  ;;  %v190_v29 = vshrl.u32 %v1145_v42, %v181_v57 }
  0x2e   :  { %v1246_v20 = vmul.u32.u64.low %v1215_v31, %v109_v18  ;;  %v1247_v21 = vmul.u32.u64.high %v1215_v31, %v109_v18, %v1246_v20  ;;  %v1250_v22 = vmul.u32.u64.low %v1215_v31, %v105_v17  ;;  %v1251_v23 = vmul.u32.u64.high %v1215_v31, %v105_v17, %v1250_v22 }
  0x2f   :  { %v192_v27 = vshll.u32 %v1145_v42, %v180_v32  ;;  %v193_v35 = vshrl.u32 %v1146_v44, %v181_v57  ;;  %v195_v37 = vshll.u32 %v1146_v44, %v180_v32  ;;  %v196_v39 = vshrl.u32 %v1147_v52, %v181_v57 }
  0x30   :  { %v117_v41 = vmul.u32 %v1215_v31, %v101_v16  ;;  %v191_v43 = vor.u32 %v190_v29, %v189_v28  ;;  %vm119_vm8 = vc.u32 %v1247_v21, %v1250_v22  ;;  %v120_v45 = vadd.s32 1, %v1251_v23 }
  0x31   :  { %v194_v47 = vor.u32 %v193_v35, %v192_v27  ;;  %v197_v48 = vor.u32 %v196_v39, %v195_v37  ;;  %vm201_vm10 = vcmp.lt.s32.totalorder %v1226_v46, 4  ;;  %v202_v32 = vsel %vm198_vm6, %v182_v14, %v185_v24 }
  0x32   :  { %v206_v49 = vsel %vm198_vm6, %v185_v24, %v188_v26  ;;  %v121_v31 = vsel %vm119_vm8, %v120_v45, %v1251_v23  ;;  %v203_v50 = vsel %vm201_vm10, %v191_v43, 2102212464  ;;  %v210_v53 = vsel %vm198_vm6, %v188_v26, %v191_v43 }
  0x33   :  { %v207_v51 = vsel %vm201_vm10, %v194_v47, 920167782  ;;  %v122_v54 = vadd.s32 %v121_v31, %v117_v41  ;;  %v204_v55 = vsel %vm200_vm9, %v188_v26, %v203_v50  ;;  %v211_v57 = vsel %vm201_vm10, %v197_v48, 1326507024 }
  0x34   :  { %v208_v56 = vsel %vm200_vm9, %v191_v43, %v207_v51  ;;  %v205_v58 = vsel %vm199_vm7, %v202_v32, %v204_v55  ;;  %v212_v60 = vsel %vm200_vm9, %v194_v47, %v211_v57  ;;  %v282_v10 = vsel %vm281_vm11, %v1219_v34, 0 }
  0x35   :  { %v209_v59 = vsel %vm199_vm7, %v206_v49, %v208_v56  ;;  %v123_v61 = vadd.s32 536870912, %v122_v54  ;;  %v213_v62 = vsel %vm199_vm7, %v210_v53, %v212_v60  ;;  %v284_v12 = vand.u32 31, %v282_v10 }
  0x36   :  { %v1277_v63 = vmul.u32.u64.low %v1217_v33, %v209_v59  ;;  %v1278_v2 = vmul.u32.u64.high %v1217_v33, %v209_v59, %v1277_v63  ;;  %v1282_v3 = vmul.u32.u64.low %v1217_v33, %v213_v62  ;;  %v1283_v9 = vmul.u32.u64.high %v1217_v33, %v213_v62, %v1282_v3 }
  0x37   :  { %v1286_v11 = vshrl.u32 %v123_v61, 30  ;;  %v221_v13 = vmul.u32 %v1217_v33, %v205_v58  ;;  %v277_v46 = vand.u32 8388607, %v270_v30  ;;  %v377_v14 = vand.u32 2139095040, %v1212_v25 }
  0x38   :  { %v224_v16 = vadd.s32 1, %v1278_v2  ;;  %vm223_vm12 = vc.u32 %v1283_v9, %v1277_v63  ;;  %v285_v17 = vsub.s32 32, %v284_v12  ;;  %v283_v24 = vshrl.u32 %v282_v10, 5 }
  0x39   :  { %v125_v15 = vshll.u32 %v1286_v11, 30  ;;  %v278_v20 = vor.u32 8388608, %v277_v46  ;;  %v378_v23 = vshrl.u32 %v377_v14, 23  ;;  %v287_v26 = vshll.u32 %v1142_v36, %v284_v12 }
  0x3a   :  { %v225_v34 = vsel %vm223_vm12, %v224_v16, %v1278_v2  ;;  %v290_v28 = vshll.u32 %v1143_v38, %v284_v12  ;;  %v288_v27 = vshrl.u32 %v1143_v38, %v285_v17  ;;  %v291_v35 = vshrl.u32 %v1144_v40, %v285_v17 }
  0x3b   :  { %v126_v18 = vsub.s32 %v122_v54, %v125_v15  ;;  %v226_v19 = vadd.s32 %v225_v34, %v221_v13  ;;  %v293_v37 = vshll.u32 %v1144_v40, %v284_v12  ;;  %v294_v41 = vshrl.u32 %v1145_v42, %v285_v17 }
  0x3c   :  { %v296_v43 = vshll.u32 %v1145_v42, %v284_v12  ;;  %v297_v45 = vshrl.u32 %v1146_v44, %v285_v17  ;;  %v299_v48 = vshll.u32 %v1146_v44, %v284_v12  ;;  %v300_v32 = vshrl.u32 %v1147_v52, %v285_v17 }
  0x3d   :  { %v128_v33 = vsub.s32 0, %v126_v18  ;;  %v227_v29 = vadd.s32 536870912, %v226_v19  ;;  %v1309_v31 = vshll.u32 %v278_v20, 8  ;;  %v997_v50 = vadd.s32 4294967169, %v378_v23 }
  0x3e   :  { %v286_v53 = vshrl.u32 %v1142_v36, %v285_v17  ;;  %v289_v54 = vor.u32 %v288_v27, %v287_v26  ;;  %v292_v55 = vor.u32 %v291_v35, %v290_v28  ;;  %v295_v57 = vor.u32 %v294_v41, %v293_v37 }
  0x3f   :  { %v986_v39 = vmin.u32 %v128_v33, %v126_v18  ;;  %v1305_v47 = vshrl.u32 %v227_v29, 30  ;;  %v298_v58 = vor.u32 %v297_v45, %v296_v43  ;;  %vm302_vm13 = vcmp.lt.s32.totalorder %v283_v24, 1 }
  0x40   :  { %v118_v59 = vadd.s32 %v1250_v22, %v1247_v21  ;;  %v301_v61 = vor.u32 %v300_v32, %v299_v48  ;;  %vm305_vm14 = vcmp.lt.s32.totalorder %v283_v24, 4  ;;  %vm303_vm0 = vcmp.lt.s32.totalorder %v283_v24, 2 }
  0x41   :  { %v130_v49 = vclz %v986_v39  ;;  %v229_v51 = vshll.u32 %v1305_v47, 30  ;;  %vm304_vm1 = vcmp.lt.s32.totalorder %v283_v24, 3  ;;  %v307_v62 = vsel %vm305_vm14, %v295_v57, 2102212464 }
  0x42   :  { %v306_v10 = vsel %vm302_vm13, %v286_v53, %v289_v54  ;;  %v310_v12 = vsel %vm302_vm13, %v289_v54, %v292_v55  ;;  %v311_v21 = vsel %vm305_vm14, %v298_v58, 920167782  ;;  %v308_v15 = vsel %vm304_vm1, %v292_v55, %v307_v62 }
  0x43   :  { %v987_v56 = vadd.s32 4294967294, %v130_v49  ;;  %v1315_v60 = vsub.s32 %v226_v19, %v229_v51  ;;  %v312_v16 = vsel %vm304_vm1, %v295_v57, %v311_v21  ;;  %v314_v17 = vsel %vm302_vm13, %v292_v55, %v295_v57 }
  0x44   :  { %v313_v20 = vsel %vm303_vm0, %v310_v12, %v312_v16  ;;  %v315_v23 = vsel %vm305_vm14, %v301_v61, 1326507024  ;;  %v50_v33 = vmul.f32 4.0, %v1182_v0  ;;  %v384_v28 = vadd.s32 1, %v997_v50 }
  0x45   :  { %vm988_vm15 = vcmp.lt.s32.totalorder %v987_v56, 0  ;;  %v232_v3 = vsub.s32 0, %v1315_v60  ;;  %v309_v35 = vsel %vm303_vm0, %v306_v10, %v308_v15  ;;  %v316_v37 = vsel %vm304_vm1, %v298_v58, %v315_v23 }
  0x46   :  { %v133_v2 = vsel %vm988_vm15, 0, %v987_v56  ;;  %v317_v41 = vsel %vm303_vm0, %v314_v17, %v316_v37  ;;  %v1334_v43 = vmul.u32.u64.low %v1309_v31, %v313_v20  ;;  %v1335_v45 = vmul.u32.u64.high %v1309_v31, %v313_v20, %v1334_v43 }
  0x47   :  { %v134_v13 = vsub.s32 32, %v133_v2  ;;  %v135_v46 = vshll.u32 %v126_v18, %v133_v2  ;;  %v138_v14 = vsub.s32 4294967266, %v133_v2  ;;  %v990_v22 = vmin.u32 %v232_v3, %v1315_v60 }
  0x48   :  { %v51_v18 = vmul.f32 5.0, %v1182_v0  ;;  %v1339_v49 = vmul.u32.u64.low %v1309_v31, %v317_v41  ;;  %v1340_v51 = vmul.u32.u64.high %v1309_v31, %v317_v41, %v1339_v49  ;;  %v52_v50 = vmul.f32 6.0, %v1182_v0 }
  0x49   :  { %v136_v34 = vshrl.u32 %v118_v59, %v134_v13  ;;  %v139_v19 = vadd.s32 127, %v138_v14  ;;  %v234_v26 = vclz %v990_v22  ;;  %v222_v53 = vadd.s32 %v1277_v63, %v1283_v9 }
  0x4a   :  { %vm385_vm3 = vcmp.gt.s32.totalorder %v384_v28, 0  ;;  %v325_v55 = vmul.u32 %v1309_v31, %v309_v35  ;;  %v328_v59 = vadd.s32 1, %v1335_v45  ;;  %v374_v61 = vand.u32 2147483647, %v1212_v25 }
  0x4b   :  { %v137_v29 = vor.u32 %v136_v34, %v135_v46  ;;  %v140_v27 = vshll.u32 %v139_v19, 23  ;;  %v991_v39 = vadd.s32 4294967294, %v234_v26  ;;  %v386_v56 = vsel %vm385_vm3, %v384_v28, 0 }
  0x4c   :  { %v1349_v62 = vmul.f32 7.0, %v1182_v0  ;;  %vm327_vm4 = vc.u32 %v1340_v51, %v1334_v43  ;;  %v388_v10 = vand.u32 31, %v386_v56  ;;  %v1356_v12 = vadd.f32 %v1187_v1, %v50_v33 }
  0x4d   :  { %v141_v48 = vor.u32 4788187, %v140_v27  ;;  %v144_v32 = vcvt.s32.f32 %v137_v29  ;;  %vm992_vm2 = vcmp.lt.s32.totalorder %v991_v39, 0  ;;  %v329_v31 = vsel %vm327_vm4, %v328_v59, %v1335_v45 }
  0x4e   :  { %v237_v54 = vsel %vm992_vm2, 0, %v991_v39  ;;  %v1359_v13 = vadd.f32 %v1187_v1, %v51_v18  ;;  %v1362_v0 = vadd.f32 %v1187_v1, %v52_v50  ;;  %v330_v46 = vadd.s32 %v329_v31, %v325_v55 }
  0x4f   :  { %v142_v24 = vand.u32 2147483647, %v141_v48  ;;  %v238_v57 = vsub.s32 32, %v237_v54  ;;  %v242_v58 = vsub.s32 4294967266, %v237_v54  ;;  %v239_v3 = vshll.u32 %v1315_v60, %v237_v54 }
  0x50   :  { %vm64_vm5 = vcmp.lt.s32.totalorder %v1196_v5, 0  ;;  %v381_v14 = vand.u32 8388607, %v374_v61  ;;  %v389_v21 = vsub.s32 32, %v388_v10  ;;  %v148_v15 = vsub.s32 4, %v1286_v11 }
  0x51   :  { %v145_v2 = vmul.f32 %v144_v32, %v142_v24  ;;  %v240_v63 = vshrl.u32 %v222_v53, %v238_v57  ;;  %v243_v9 = vadd.s32 127, %v242_v58  ;;  %v331_v16 = vadd.s32 536870912, %v330_v46 }
  0x52   :  { %v387_v17 = vshrl.u32 %v386_v56, 5  ;;  %vm1370_vm6 = vcmp.le.f32.partialorder %v62_v8, 0.7853982  ;;  %v391_v23 = vshll.u32 %v1142_v36, %v388_v10  ;;  %v392_v18 = vshrl.u32 %v1143_v38, %v389_v21 }
  0x53   :  { %v244_v60 = vshll.u32 %v243_v9, 23  ;;  %v146_v22 = vxor.u32 2147483648, %v145_v2  ;;  %v241_v19 = vor.u32 %v240_v63, %v239_v3  ;;  %v1375_v33 = vshrl.u32 %v331_v16, 30 }
  0x54   :  { %v394_v26 = vshll.u32 %v1143_v38, %v388_v10  ;;  %v395_v28 = vshrl.u32 %v1144_v40, %v389_v21  ;;  %v382_v29 = vor.u32 8388608, %v381_v14  ;;  %v397_v27 = vshll.u32 %v1144_v40, %v388_v10 }
  0x55   :  { %v245_v20 = vor.u32 4788187, %v244_v60  ;;  %v398_v8 = vshrl.u32 %v1145_v42, %v389_v21  ;;  %v400_v35 = vshll.u32 %v1145_v42, %v388_v10  ;;  %v147_v37 = vsel %vm64_vm5, %v146_v22, %v145_v2 }
  0x56   :  { %v149_v39 = vsel %vm64_vm5, %v148_v15, %v1286_v11  ;;  %v333_v41 = vshll.u32 %v1375_v33, 30  ;;  %vm406_vm7 = vcmp.lt.s32.totalorder %v387_v17, 1  ;;  %v248_v48 = vcvt.s32.f32 %v241_v19 }
  0x57   :  { %v246_v45 = vand.u32 2147483647, %v245_v20  ;;  %v401_v32 = vshrl.u32 %v1146_v44, %v389_v21  ;;  %v403_v49 = vshll.u32 %v1146_v44, %v388_v10  ;;  %v393_v53 = vor.u32 %v392_v18, %v391_v23 }
  0x58   :  { %v1391_v50 = vsub.s32 %v330_v46, %v333_v41  ;;  %v396_v24 = vor.u32 %v395_v28, %v394_v26  ;;  %v404_v54 = vshrl.u32 %v1147_v52, %v389_v21  ;;  %v150_v55 = vsel %vm1370_vm6, %v1196_v5, %v147_v37 }
  0x59   :  { %v399_v11 = vor.u32 %v398_v8, %v397_v27  ;;  %v402_v56 = vor.u32 %v401_v32, %v400_v35  ;;  %vm409_vm8 = vcmp.lt.s32.totalorder %v387_v17, 4  ;;  %v252_v57 = vsub.s32 4, %v1305_v47 }
  0x5a   :  { %v336_v58 = vsub.s32 0, %v1391_v50  ;;  %v390_v59 = vshrl.u32 %v1142_v36, %v389_v21  ;;  %vm408_vm9 = vcmp.lt.s32.totalorder %v387_v17, 3  ;;  %v405_v2 = vor.u32 %v404_v54, %v403_v49 }
  0x5b   :  { %vm407_vm10 = vcmp.lt.s32.totalorder %v387_v17, 2  ;;  %v411_v3 = vsel %vm409_vm8, %v399_v11, 2102212464  ;;  %v415_v63 = vsel %vm409_vm8, %v402_v56, 920167782  ;;  %1059 = vcosq.f32 %v150_v55 }
  0x5c   :  { %vm1404_vm11 = vcmp.le.f32.partialorder %v166_v6, 0.7853982  ;;  %v249_v31 = vmul.f32 %v248_v48, %v246_v45  ;;  %v994_v10 = vmin.u32 %v336_v58, %v1391_v50  ;;  %v414_v46 = vsel %vm406_vm7, %v393_v53, %v396_v24 }
  0x5d   :  { %1061 = vsinq.f32 %v150_v55  ;;  %vm168_vm12 = vcmp.lt.s32.totalorder %v1193_v4, 0  ;;  %v416_v60 = vsel %vm408_vm9, %v399_v11, %v415_v63  ;;  %v422_v14 = vshll.u32 %v382_v29, 8 }
  0x5e   :  { %vm272_vm13 = vcmp.lt.s32.totalorder %v1200_v7, 0  ;;  %v338_v21 = vclz %v994_v10  ;;  %v410_v22 = vsel %vm406_vm7, %v390_v59, %v393_v53  ;;  %v412_v6 = vsel %vm408_vm9, %v396_v24, %v411_v3 }
  0x5f   :  { %v418_v15 = vsel %vm406_vm7, %v396_v24, %v399_v11  ;;  %v151_v16 = vsel %vm1370_vm6, 0, %v149_v39  ;;  %v417_v19 = vsel %vm407_vm10, %v414_v46, %v416_v60  ;;  %v419_v20 = vsel %vm409_vm8, %v405_v2, 1326507024 }
  0x60   :  { %v481_v23 = vand.u32 2139095040, %v1356_v12  ;;  %v250_v18 = vxor.u32 2147483648, %v249_v31  ;;  %v253_v26 = vsel %vm168_vm12, %v252_v57, %v1305_v47  ;;  %v995_v28 = vadd.s32 4294967294, %v338_v21 }
  0x61   :  { %v420_v29 = vsel %vm408_vm9, %v402_v56, %v419_v20  ;;  %v413_v27 = vsel %vm407_vm10, %v410_v22, %v412_v6  ;;  %v1427_v34 = vmul.u32.u64.low %v422_v14, %v417_v19  ;;  %v1428_v35 = vmul.u32.u64.high %v422_v14, %v417_v19, %v1427_v34 }
  0x62   :  { %v421_v8 = vsel %vm407_vm10, %v418_v15, %v420_v29  ;;  %v326_v37 = vadd.s32 %v1334_v43, %v1340_v51  ;;  %vm996_vm14 = vcmp.lt.s32.totalorder %v995_v28, 0  ;;  %v155_v45 = vadd.s32 3, %v151_v16 }
  0x63   :  { %v1433_v39 = vmul.u32.u64.low %v422_v14, %v421_v8  ;;  %v1434_v41 = vmul.u32.u64.high %v422_v14, %v421_v8, %v1433_v39  ;;  %v341_v47 = vsel %vm996_vm14, 0, %v995_v28  ;;  %v356_v48 = vsub.s32 4, %v1375_v33 }
  0x64   :  { %v482_v32 = vshrl.u32 %v481_v23, 23  ;;  %v342_v49 = vsub.s32 32, %v341_v47  ;;  %v346_v53 = vsub.s32 4294967266, %v341_v47  ;;  %v429_v17 = vmul.u32 %v422_v14, %v413_v27 }
  0x65   :  { %v478_v24 = vand.u32 2147483647, %v1356_v12  ;;  %v251_v54 = vsel %vm168_vm12, %v250_v18, %v249_v31  ;;  %v255_v43 = vsel %vm1404_vm11, 0, %v253_v26  ;;  %v432_v51 = vadd.s32 1, %v1428_v35  ;;  %v1060_v11 = vpop.eup %1059 }
  0x66   :  { %v1001_v55 = vadd.s32 4294967169, %v482_v32  ;;  %v343_v56 = vshll.u32 %v1391_v50, %v341_v47  ;;  %v344_v57 = vshrl.u32 %v326_v37, %v342_v49  ;;  %v347_v58 = vadd.s32 127, %v346_v53 }
  0x67   :  { %vm431_vm15 = vc.u32 %v1434_v41, %v1427_v34  ;;  %v1062_v59 = vpop.eup %1061  ;;  %v1446_v2 = vand.u32 3, %v155_v45  ;;  %v357_v3 = vsel %vm272_vm13, %v356_v48, %v1375_v33  ;;  %v1454_v10 = vadd.f32 %v1187_v1, %v1349_v62 }
  0x68   :  { %v433_v63 = vsel %vm431_vm15, %v432_v51, %v1428_v35  ;;  %v488_v31 = vadd.s32 1, %v1001_v55  ;;  %v348_v50 = vshll.u32 %v347_v58, 23  ;;  %v485_v60 = vand.u32 8388607, %v478_v24 }
  0x69   :  { %v434_v46 = vadd.s32 %v433_v63, %v429_v17  ;;  %v254_v14 = vsel %vm1404_vm11, %v1193_v4, %v251_v54  ;;  %v259_v21 = vadd.s32 3, %v255_v43  ;;  %vm1463_vm0 = vcmp.le.f32.partialorder %v270_v30, 0.7853982 }
  0x6a   :  { %vm489_vm1 = vcmp.gt.s32.totalorder %v488_v31, 0  ;;  %v345_v22 = vor.u32 %v344_v57, %v343_v56  ;;  %v349_v1 = vor.u32 4788187, %v348_v50  ;;  %v359_v62 = vsel %vm1463_vm0, 0, %v357_v3 }
  0x6b   :  { %v435_v6 = vadd.s32 536870912, %v434_v46  ;;  %vm158_vm2 = vcmp.eq.s32.totalorder %v1446_v2, 0  ;;  %v159_v15 = vxor.u32 2147483648, %v1062_v59  ;;  %v162_v16 = vxor.u32 2147483648, %v1060_v11 }
  0x6c   :  { %v490_v9 = vsel %vm489_vm1, %v488_v31, 0  ;;  %vm161_vm3 = vcmp.eq.s32.totalorder %v1446_v2, 2  ;;  %1063 = vcosq.f32 %v254_v14  ;;  %v486_v30 = vor.u32 8388608, %v485_v60 }
  0x6d   :  { %v1471_v19 = vshrl.u32 %v435_v6, 30  ;;  %1065 = vsinq.f32 %v254_v14  ;;  %v1473_v20 = vand.u32 3, %v259_v21  ;;  %v1475_v23 = vadd.s32 3, %v359_v62 }
  0x6e   :  { %v492_v18 = vand.u32 31, %v490_v9  ;;  %v350_v26 = vand.u32 2147483647, %v349_v1  ;;  %v352_v28 = vcvt.s32.f32 %v345_v22  ;;  %v585_v27 = vand.u32 2139095040, %v1359_v13 }
  0x6f   :  { %v437_v29 = vshll.u32 %v1471_v19, 30  ;;  %v1481_v8 = vsel %vm158_vm2, %v1060_v11, %v159_v15  ;;  %v1483_v35 = vsel %vm161_vm3, %v162_v16, %v1062_v59  ;;  %v491_v37 = vshrl.u32 %v490_v9, 5 }
  0x70   :  { %v493_v39 = vsub.s32 32, %v492_v18  ;;  %v495_v47 = vshll.u32 %v1142_v36, %v492_v18  ;;  %v498_v48 = vshll.u32 %v1143_v38, %v492_v18  ;;  %v1489_v32 = vshll.u32 %v486_v30, 8 }
  0x71   :  { %v1485_v45 = vsub.s32 %v434_v46, %v437_v29  ;;  %v501_v17 = vshll.u32 %v1144_v40, %v492_v18  ;;  %v504_v54 = vshll.u32 %v1145_v42, %v492_v18  ;;  %v353_v43 = vmul.f32 %v352_v28, %v350_v26 }
  0x72   :  { %v496_v49 = vshrl.u32 %v1143_v38, %v493_v39  ;;  %v499_v53 = vshrl.u32 %v1144_v40, %v493_v39  ;;  %v502_v55 = vshrl.u32 %v1145_v42, %v493_v39  ;;  %v586_v11 = vshrl.u32 %v585_v27, 23 }
  0x73   :  { %v440_v51 = vsub.s32 0, %v1485_v45  ;;  %v430_v56 = vadd.s32 %v1427_v34, %v1434_v41  ;;  %v505_v57 = vshrl.u32 %v1146_v44, %v493_v39  ;;  %vm510_vm4 = vcmp.lt.s32.totalorder %v491_v37, 1 }
  0x74   :  { %v582_v58 = vand.u32 2147483647, %v1359_v13  ;;  %v494_v3 = vshrl.u32 %v1142_v36, %v493_v39  ;;  %v497_v63 = vor.u32 %v496_v49, %v495_v47  ;;  %v500_v31 = vor.u32 %v499_v53, %v498_v48 }
  0x75   :  { %v998_v59 = vmin.u32 %v440_v51, %v1485_v45  ;;  %v503_v50 = vor.u32 %v502_v55, %v501_v17  ;;  %v506_v46 = vor.u32 %v505_v57, %v504_v54  ;;  %v507_v60 = vshll.u32 %v1146_v44, %v492_v18 }
  0x76   :  { %v508_v14 = vshrl.u32 %v1147_v52, %v493_v39  ;;  %v1505_v21 = vpop.eup %1063  ;;  %vm157_vm5 = vcmp.lt.s32.totalorder %v1446_v2, 2  ;;  %v354_v34 = vxor.u32 2147483648, %v353_v43  ;;  %vm376_vm6 = vcmp.lt.s32.totalorder %v1212_v25, 0 }
  0x77   :  { %v442_v41 = vclz %v998_v59  ;;  %v460_v22 = vsub.s32 4, %v1471_v19  ;;  %v1005_v1 = vadd.s32 4294967169, %v586_v11  ;;  %v1510_v62 = vpop.eup %1065  ;;  %vm265_vm7 = vcmp.eq.s32.totalorder %v1473_v20, 2 }
  0x78   :  { %v509_v6 = vor.u32 %v508_v14, %v507_v60  ;;  %vm511_vm8 = vcmp.lt.s32.totalorder %v491_v37, 2  ;;  %vm512_vm9 = vcmp.lt.s32.totalorder %v491_v37, 3  ;;  %vm513_vm10 = vcmp.lt.s32.totalorder %v491_v37, 4 }
  0x79   :  { %v999_v15 = vadd.s32 4294967294, %v442_v41  ;;  %v514_v16 = vsel %vm510_vm4, %v494_v3, %v497_v63  ;;  %v515_v9 = vsel %vm513_vm10, %v503_v50, 2102212464  ;;  %v518_v30 = vsel %vm510_vm4, %v497_v63, %v500_v31 }
  0x7a   :  { %v516_v18 = vsel %vm512_vm9, %v500_v31, %v515_v9  ;;  %v519_v26 = vsel %vm513_vm10, %v506_v46, 920167782  ;;  %v522_v28 = vsel %vm510_vm4, %v500_v31, %v503_v50  ;;  %v523_v29 = vsel %vm513_vm10, %v509_v6, 1326507024 }
  0x7b   :  { %v355_v27 = vsel %vm272_vm13, %v354_v34, %v353_v43  ;;  %vm1520_vm11 = vcmp.le.f32.partialorder %v374_v61, 0.7853982  ;;  %vm1000_vm12 = vcmp.lt.s32.totalorder %v999_v15, 0  ;;  %v520_v47 = vsel %vm512_vm9, %v503_v50, %v519_v26 }
  0x7c   :  { %v524_v48 = vsel %vm512_vm9, %v506_v46, %v523_v29  ;;  %v445_v49 = vsel %vm1000_vm12, 0, %v999_v15  ;;  %v517_v53 = vsel %vm511_vm8, %v514_v16, %v516_v18  ;;  %v521_v17 = vsel %vm511_vm8, %v518_v30, %v520_v47 }
  0x7d   :  { %v525_v54 = vsel %vm511_vm8, %v522_v28, %v524_v48  ;;  %v446_v51 = vsub.s32 32, %v445_v49  ;;  %v447_v55 = vshll.u32 %v1485_v45, %v445_v49  ;;  %v450_v43 = vsub.s32 4294967266, %v445_v49 }
  0x7e   :  { %v592_v11 = vadd.s32 1, %v1005_v1  ;;  %v1529_v61 = vmul.u32.u64.low %v1489_v32, %v525_v54  ;;  %v1530_v57 = vmul.u32.u64.high %v1489_v32, %v525_v54, %v1529_v61  ;;  %v266_v63 = vxor.u32 2147483648, %v1505_v21 }
  0x7f   :  { %v1533_v59 = vmul.u32.u64.low %v1489_v32, %v521_v17  ;;  %v1534_v3 = vmul.u32.u64.high %v1489_v32, %v521_v17, %v1533_v59  ;;  %v448_v31 = vshrl.u32 %v430_v56, %v446_v51  ;;  %v451_v50 = vadd.s32 127, %v450_v43 }
  0x80   :  { %vm593_vm13 = vcmp.gt.s32.totalorder %v592_v11, 0  ;;  %v1539_v37 = vand.u32 3, %v1475_v23  ;;  %v461_v45 = vsel %vm376_vm6, %v460_v22, %v1471_v19  ;;  %v1546_v46 = vand.u32 8388607, %v582_v58 }
  0x81   :  { %v594_v60 = vsel %vm593_vm13, %v592_v11, 0  ;;  %v358_v14 = vsel %vm1463_vm0, %v1200_v7, %v355_v27  ;;  %v449_v34 = vor.u32 %v448_v31, %v447_v55  ;;  %v452_v56 = vshll.u32 %v451_v50, 23 }
  0x82   :  { %v533_v41 = vmul.u32 %v1489_v32, %v517_v53  ;;  %v1556_v23 = vsel %vm157_vm5, %v1481_v8, %v1483_v35  ;;  %v263_v19 = vxor.u32 2147483648, %v1510_v62  ;;  %vm535_vm14 = vc.u32 %v1530_v57, %v1533_v59 }
  0x83   :  { %v536_v22 = vadd.s32 1, %v1534_v3  ;;  %v1565_v33 = vsel %vm265_vm7, %v266_v63, %v1510_v62  ;;  %v453_v1 = vor.u32 4788187, %v452_v56  ;;  %v456_v32 = vcvt.s32.f32 %v449_v34 }
  0x84   :  { %v596_v6 = vand.u32 31, %v594_v60  ;;  %vm262_vm15 = vcmp.eq.s32.totalorder %v1473_v20, 0  ;;  %1067 = vcosq.f32 %v358_v14  ;;  %v463_v2 = vsel %vm1520_vm11, 0, %v461_v45 }
  0x85   :  { %v537_v8 = vsel %vm535_vm14, %v536_v22, %v1534_v3  ;;  %v590_v35 = vor.u32 8388608, %v1546_v46  ;;  %1069 = vsinq.f32 %v358_v14  ;;  %v454_v15 = vand.u32 2147483647, %v453_v1 }
  0x86   :  { %v538_v16 = vadd.s32 %v537_v8, %v533_v41  ;;  %v597_v9 = vsub.s32 32, %v596_v6  ;;  %v1572_v30 = vshrl.u32 %v594_v60, 5  ;;  %v599_v62 = vshll.u32 %v1142_v36, %v596_v6 }
  0x87   :  { %v602_v18 = vshll.u32 %v1143_v38, %v596_v6  ;;  %v608_v26 = vshll.u32 %v1145_v42, %v596_v6  ;;  %v457_v28 = vmul.f32 %v456_v32, %v454_v15  ;;  %v605_v47 = vshll.u32 %v1144_v40, %v596_v6 }
  0x88   :  { %v539_v29 = vadd.s32 536870912, %v538_v16  ;;  %v600_v27 = vshrl.u32 %v1143_v38, %v597_v9  ;;  %v603_v48 = vshrl.u32 %v1144_v40, %v597_v9  ;;  %v606_v49 = vshrl.u32 %v1145_v42, %v597_v9 }
  0x89   :  { %v609_v53 = vshrl.u32 %v1146_v44, %v597_v9  ;;  %v611_v17 = vshll.u32 %v1146_v44, %v596_v6  ;;  %v458_v54 = vxor.u32 2147483648, %v457_v28  ;;  %v612_v43 = vshrl.u32 %v1147_v52, %v597_v9 }
  0x8a   :  { %v540_v51 = vshrl.u32 %v539_v29, 30  ;;  %v601_v55 = vor.u32 %v600_v27, %v599_v62  ;;  %vm154_vm0 = vweird.f32 %v1196_v5  ;;  %vm261_vm1 = vcmp.lt.s32.totalorder %v1473_v20, 2 }
  0x8b   :  { %v467_v11 = vadd.s32 3, %v463_v2  ;;  %v604_v61 = vor.u32 %v603_v48, %v602_v18  ;;  %v610_v3 = vor.u32 %v609_v53, %v608_v26  ;;  %vm614_vm2 = vcmp.lt.s32.totalorder %v1572_v30, 1 }
  0x8c   :  { %v459_v63 = vsel %vm376_vm6, %v458_v54, %v457_v28  ;;  %v541_v31 = vshll.u32 %v540_v51, 30  ;;  %v607_v50 = vor.u32 %v606_v49, %v605_v47  ;;  %vm615_vm3 = vcmp.lt.s32.totalorder %v1572_v30, 2 }
  0x8d   :  { %vm366_vm4 = vcmp.eq.s32.totalorder %v1539_v37, 0  ;;  %v462_v45 = vsel %vm1520_vm11, %v1212_v25, %v459_v63  ;;  %vm480_vm5 = vcmp.lt.s32.totalorder %v1356_v12, 0  ;;  %v613_v46 = vor.u32 %v612_v43, %v611_v17 }
  0x8e   :  { %vm616_vm7 = vcmp.lt.s32.totalorder %v1572_v30, 3  ;;  %vm617_vm8 = vcmp.lt.s32.totalorder %v1572_v30, 4  ;;  %1071 = vcosq.f32 %v462_v45  ;;  %v1597_v60 = vsub.s32 %v538_v16, %v541_v31  ;;  %v1068_v56 = vpop.eup %1067 }
  0x8f   :  { %v598_v14 = vshrl.u32 %v1142_v36, %v597_v9  ;;  %v622_v34 = vsel %vm614_vm2, %v601_v55, %v604_v61  ;;  %1073 = vsinq.f32 %v462_v45  ;;  %v619_v39 = vsel %vm617_vm8, %v607_v50, 2102212464  ;;  %v1070_v1 = vpop.eup %1069 }
  0x90   :  { %v623_v41 = vsel %vm617_vm8, %v610_v3, 920167782  ;;  %v630_v22 = vshll.u32 %v590_v35, 8  ;;  %v264_v32 = vsel %vm262_vm15, %v1505_v21, %v263_v19  ;;  %v1609_v6 = vand.u32 3, %v467_v11 }
  0x91   :  { %vm1613_vm6 = vcmp.le.f32.partialorder %v478_v24, 0.7853982  ;;  %v544_v8 = vsub.s32 0, %v1597_v60  ;;  %v624_v15 = vsel %vm616_vm7, %v607_v50, %v623_v41  ;;  %v564_v16 = vsub.s32 4, %v540_v51 }
  0x92   :  { %v625_v35 = vsel %vm615_vm3, %v622_v34, %v624_v15  ;;  %v626_v21 = vsel %vm614_vm2, %v604_v61, %v607_v50  ;;  %v627_v19 = vsel %vm617_vm8, %v613_v46, 1326507024  ;;  %vm365_vm9 = vcmp.lt.s32.totalorder %v1539_v37, 2 }
  0x93   :  { %v1002_v24 = vmin.u32 %v544_v8, %v1597_v60  ;;  %v618_v9 = vsel %vm614_vm2, %v598_v14, %v601_v55  ;;  %v620_v62 = vsel %vm616_vm7, %v604_v61, %v619_v39  ;;  %v628_v18 = vsel %vm616_vm7, %v610_v3, %v627_v19 }
  0x94   :  { %v370_v26 = vxor.u32 2147483648, %v1068_v56  ;;  %v629_v28 = vsel %vm615_vm3, %v626_v21, %v628_v18  ;;  %v1636_v29 = vmul.u32.u64.low %v630_v22, %v625_v35  ;;  %v1637_v27 = vmul.u32.u64.high %v630_v22, %v625_v35, %v1636_v29 }
  0x95   :  { %v367_v47 = vxor.u32 2147483648, %v1070_v1  ;;  %vm369_vm10 = vcmp.eq.s32.totalorder %v1539_v37, 2  ;;  %v546_v48 = vclz %v1002_v24  ;;  %v686_v49 = vand.u32 2147483647, %v1362_v0 }
  0x96   :  { %v621_v53 = vsel %vm615_vm3, %v618_v9, %v620_v62  ;;  %v1644_v17 = vmul.u32.u64.low %v630_v22, %v629_v28  ;;  %v1645_v54 = vmul.u32.u64.high %v630_v22, %v629_v28, %v1644_v17  ;;  %v689_v55 = vand.u32 2139095040, %v1362_v0 }
  0x97   :  { %v1651_v43 = vsel %vm154_vm0, nan, %v1556_v23  ;;  %vm258_vm11 = vweird.f32 %v1193_v4  ;;  %v268_v11 = vsel %vm261_vm1, %v264_v32, %v1565_v33  ;;  %vm362_vm12 = vweird.f32 %v1200_v7 }
  0x98   :  { %v1003_v30 = vadd.s32 4294967294, %v546_v48  ;;  %v565_v61 = vsel %vm480_vm5, %v564_v16, %v540_v51  ;;  %v371_v3 = vsel %vm369_vm10, %v370_v26, %v1070_v1  ;;  %vm470_vm13 = vcmp.eq.s32.totalorder %v1609_v6, 0  ;;  %v1072_v23 = vpop.eup %1071 }
  0x99   :  { %v640_v63 = vadd.s32 1, %v1637_v27  ;;  %v690_v5 = vshrl.u32 %v689_v55, 23  ;;  %v368_v31 = vsel %vm366_vm4, %v1068_v56, %v367_v47  ;;  %vm469_vm14 = vcmp.lt.s32.totalorder %v1609_v6, 2  ;;  %v1074_v50 = vpop.eup %1073 }
  0x9a   :  { %v534_v20 = vadd.s32 %v1533_v59, %v1530_v57  ;;  %vm1004_vm15 = vcmp.lt.s32.totalorder %v1003_v30, 0  ;;  %v637_v33 = vmul.u32 %v630_v22, %v621_v53  ;;  %v567_v51 = vsel %vm1613_vm6, 0, %v565_v61 }
  0x9b   :  { %v549_v45 = vsel %vm1004_vm15, 0, %v1003_v30  ;;  %vm639_vm0 = vc.u32 %v1645_v54, %v1636_v29  ;;  %v693_v46 = vand.u32 8388607, %v686_v49  ;;  %v793_v39 = vand.u32 2139095040, %v1454_v10 }
  0x9c   :  { %v550_v14 = vsub.s32 32, %v549_v45  ;;  %v551_v34 = vshll.u32 %v1597_v60, %v549_v45  ;;  %v554_v56 = vsub.s32 4294967266, %v549_v45  ;;  %v471_v57 = vxor.u32 2147483648, %v1074_v50 }
  0x9d   :  { %v474_v59 = vxor.u32 2147483648, %v1072_v23  ;;  %v641_v41 = vsel %vm639_vm0, %v640_v63, %v1637_v27  ;;  %v1009_v22 = vadd.s32 4294967169, %v690_v5  ;;  %vm473_vm1 = vcmp.eq.s32.totalorder %v1609_v6, 2 }
  0x9e   :  { %v552_v1 = vshrl.u32 %v534_v20, %v550_v14  ;;  %v555_v32 = vadd.s32 127, %v554_v56  ;;  %v642_v8 = vadd.s32 %v641_v41, %v637_v33  ;;  %v372_v15 = vsel %vm365_vm9, %v368_v31, %v371_v3 }
  0x9f   :  { %v571_v16 = vadd.s32 3, %v567_v51  ;;  %v696_v35 = vadd.s32 1, %v1009_v22  ;;  %v790_v60 = vand.u32 2147483647, %v1454_v10  ;;  %v694_v9 = vor.u32 8388608, %v693_v46 }
  0xa0   :  { %v553_v21 = vor.u32 %v552_v1, %v551_v34  ;;  %v556_v19 = vshll.u32 %v555_v32, 23  ;;  %v643_v24 = vadd.s32 536870912, %v642_v8  ;;  %v472_v62 = vsel %vm470_vm13, %v1072_v23, %v471_v57 }
  0xa1   :  { %v475_v18 = vsel %vm473_vm1, %v474_v59, %v1074_v50  ;;  %vm697_vm2 = vcmp.gt.s32.totalorder %v696_v35, 0  ;;  %v794_v26 = vshrl.u32 %v793_v39, 23  ;;  %v1686_v48 = vsel %vm258_vm11, nan, %v268_v11 }
  0xa2   :  { %v557_v28 = vor.u32 4788187, %v556_v19  ;;  %v560_v27 = vcvt.s32.f32 %v553_v21  ;;  %v1682_v47 = vshrl.u32 %v643_v24, 30  ;;  %v698_v37 = vsel %vm697_vm2, %v696_v35, 0 }
  0xa3   :  { %v1690_v53 = vsel %vm362_vm12, nan, %v372_v15  ;;  %v1692_v17 = vand.u32 3, %v571_v16  ;;  %v700_v55 = vand.u32 31, %v698_v37  ;;  %v1696_v61 = vadd.s32 %v1636_v29, %v1645_v54 }
  0xa4   :  { %v558_v30 = vand.u32 2147483647, %v557_v28  ;;  %v645_v3 = vshll.u32 %v1682_v47, 30  ;;  %v1701_v63 = vand.u32 8388607, %v790_v60  ;;  %v1705_v4 = vsel %vm469_vm14, %v472_v62, %v475_v18 }
  0xa5   :  { %v701_v7 = vsub.s32 32, %v700_v55  ;;  %v1707_v11 = vshll.u32 %v694_v9, 8  ;;  %v1013_v5 = vadd.s32 4294967169, %v794_v26  ;;  %v703_v29 = vshll.u32 %v1142_v36, %v700_v55 }
  0xa6   :  { %v561_v23 = vmul.f32 %v560_v27, %v558_v30  ;;  %v1709_v31 = vsub.s32 %v642_v8, %v645_v3  ;;  %v706_v54 = vshll.u32 %v1143_v38, %v700_v55  ;;  %v709_v50 = vshll.u32 %v1144_v40, %v700_v55 }
  0xa7   :  { %v704_v20 = vshrl.u32 %v1143_v38, %v701_v7  ;;  %v707_v33 = vshrl.u32 %v1144_v40, %v701_v7  ;;  %v712_v6 = vshll.u32 %v1145_v42, %v700_v55  ;;  %v699_v46 = vshrl.u32 %v698_v37, 5 }
  0xa8   :  { %v562_v45 = vxor.u32 2147483648, %v561_v23  ;;  %v648_v51 = vsub.s32 0, %v1709_v31  ;;  %v710_v14 = vshrl.u32 %v1145_v42, %v701_v7  ;;  %v702_v34 = vshrl.u32 %v1142_v36, %v701_v7 }
  0xa9   :  { %v713_v56 = vshrl.u32 %v1146_v44, %v701_v7  ;;  %v715_v39 = vshll.u32 %v1146_v44, %v700_v55  ;;  %v798_v57 = vor.u32 8388608, %v1701_v63  ;;  %v705_v22 = vor.u32 %v704_v20, %v703_v29 }
  0xaa   :  { %v563_v59 = vsel %vm480_vm5, %v562_v45, %v561_v23  ;;  %v1006_v41 = vmin.u32 %v648_v51, %v1709_v31  ;;  %v708_v1 = vor.u32 %v707_v33, %v706_v54  ;;  %vm584_vm3 = vcmp.lt.s32.totalorder %v1359_v13, 0 }
  0xab   :  { %v566_v32 = vsel %vm1613_vm6, %v1356_v12, %v563_v59  ;;  %v711_v8 = vor.u32 %v710_v14, %v709_v50  ;;  %v714_v15 = vor.u32 %v713_v56, %v712_v6  ;;  %v716_v16 = vshrl.u32 %v1147_v52, %v701_v7 }
  0xac   :  { %vm466_vm4 = vweird.f32 %v1212_v25  ;;  %1075 = vcosq.f32 %v566_v32  ;;  %v650_v35 = vclz %v1006_v41  ;;  %vm718_vm7 = vcmp.lt.s32.totalorder %v699_v46, 1 }
  0xad   :  { %v800_v21 = vadd.s32 1, %v1013_v5  ;;  %1077 = vsinq.f32 %v566_v32  ;;  %v668_v19 = vsub.s32 4, %v1682_v47  ;;  %v717_v24 = vor.u32 %v716_v16, %v715_v39 }
  0xae   :  { %vm719_vm5 = vcmp.lt.s32.totalorder %v699_v46, 2  ;;  %vm1735_vm8 = vcmp.le.f32.partialorder %v582_v58, 0.7853982  ;;  %v1007_v9 = vadd.s32 4294967294, %v650_v35  ;;  %vm720_vm6 = vcmp.lt.s32.totalorder %v699_v46, 3 }
  0xaf   :  { %vm721_vm9 = vcmp.lt.s32.totalorder %v699_v46, 4  ;;  %v722_v62 = vsel %vm718_vm7, %v702_v34, %v705_v22  ;;  %v726_v26 = vsel %vm718_vm7, %v705_v22, %v708_v1  ;;  %v730_v27 = vsel %vm718_vm7, %v708_v1, %v711_v8 }
  0xb0   :  { %v723_v18 = vsel %vm721_vm9, %v711_v8, 2102212464  ;;  %v727_v28 = vsel %vm721_vm9, %v714_v15, 920167782  ;;  %vm1008_vm10 = vcmp.lt.s32.totalorder %v1007_v9, 0  ;;  %v669_v34 = vsel %vm584_vm3, %v668_v19, %v1682_v47 }
  0xb1   :  { %v724_v37 = vsel %vm720_vm6, %v708_v1, %v723_v18  ;;  %v728_v55 = vsel %vm720_vm6, %v711_v8, %v727_v28  ;;  %v731_v30 = vsel %vm721_vm9, %v717_v24, 1326507024  ;;  %v653_v3 = vsel %vm1008_vm10, 0, %v1007_v9 }
  0xb2   :  { %v725_v7 = vsel %vm719_vm5, %v722_v62, %v724_v37  ;;  %v729_v58 = vsel %vm719_vm5, %v726_v26, %v728_v55  ;;  %v732_v5 = vsel %vm720_vm6, %v714_v15, %v731_v30  ;;  %v654_v23 = vsub.s32 32, %v653_v3 }
  0xb3   :  { %v655_v29 = vshll.u32 %v1709_v31, %v653_v3  ;;  %v658_v54 = vsub.s32 4294967266, %v653_v3  ;;  %v733_v20 = vsel %vm719_vm5, %v730_v27, %v732_v5  ;;  %vm801_vm11 = vcmp.gt.s32.totalorder %v800_v21, 0 }
  0xb4   :  { %v1744_v33 = vmul.u32.u64.low %v1707_v11, %v733_v20  ;;  %v1745_v50 = vmul.u32.u64.high %v1707_v11, %v733_v20, %v1744_v33  ;;  %v1748_v6 = vmul.u32.u64.low %v1707_v11, %v729_v58  ;;  %v1749_v45 = vmul.u32.u64.high %v1707_v11, %v729_v58, %v1748_v6 }
  0xb5   :  { %v656_v51 = vshrl.u32 %v1696_v61, %v654_v23  ;;  %v659_v14 = vadd.s32 127, %v658_v54  ;;  %vm574_vm12 = vcmp.eq.s32.totalorder %v1692_v17, 0  ;;  %vm577_vm13 = vcmp.eq.s32.totalorder %v1692_v17, 2 }
  0xb6   :  { %v802_v31 = vsel %vm801_vm11, %v800_v21, 0  ;;  %v910_v46 = vlaneseq  ;;  %v1076_v56 = vpop.eup %1075  ;;  %v741_v41 = vmul.u32 %v1707_v11, %v725_v7  ;;  %v1762_v61 = vsel %vm466_vm4, nan, %v1705_v4 }
  0xb7   :  { %v657_v39 = vor.u32 %v656_v51, %v655_v29  ;;  %v660_v59 = vshll.u32 %v659_v14, 23  ;;  %v804_v22 = vand.u32 31, %v802_v31  ;;  %v1078_v1 = vpop.eup %1077  ;;  %v671_v47 = vsel %vm1735_vm8, 0, %v669_v34 }
  0xb8   :  { %vm743_vm14 = vc.u32 %v1745_v50, %v1748_v6  ;;  %v744_v32 = vadd.s32 1, %v1749_v45  ;;  %vm573_vm15 = vcmp.lt.s32.totalorder %v1692_v17, 2  ;;  %v1772_v16 = vshll.u32 %v798_v57, 8 }
  0xb9   :  { %v661_v8 = vor.u32 4788187, %v660_v59  ;;  %v664_v15 = vcvt.s32.f32 %v657_v39  ;;  %v805_v11 = vsub.s32 32, %v804_v22  ;;  %v575_v25 = vxor.u32 2147483648, %v1078_v1 }
  0xba   :  { %v578_v4 = vxor.u32 2147483648, %v1076_v56  ;;  %v745_v35 = vsel %vm743_vm14, %v744_v32, %v1749_v45  ;;  %v911_v21 = vshrl.u32 %v910_v46, 7  ;;  %v675_v24 = vadd.s32 3, %v671_v47 }
  0xbb   :  { %v662_v19 = vand.u32 2147483647, %v661_v8  ;;  %v746_v9 = vadd.s32 %v745_v35, %v741_v41  ;;  %v807_v62 = vshll.u32 %v1142_v36, %v804_v22  ;;  %vm570_vm0 = vweird.f32 %v1356_v12  ;;  %v894_v35 = vld [vmem:[#allocation2] sm:$0x3] }
  0xbc   :  { %v808_v18 = vshrl.u32 %v1143_v38, %v805_v11  ;;  %v810_v26 = vshll.u32 %v1143_v38, %v804_v22  ;;  %v811_v63 = vshrl.u32 %v1144_v40, %v805_v11  ;;  %v813_v57 = vshll.u32 %v1144_v40, %v804_v22 }
  0xbd   :  { %v665_v28 = vmul.f32 %v664_v15, %v662_v19  ;;  %v747_v27 = vadd.s32 536870912, %v746_v9  ;;  %v803_v37 = vshrl.u32 %v802_v31, 5  ;;  %v814_v55 = vshrl.u32 %v1145_v42, %v805_v11 }
  0xbe   :  { %v576_v30 = vsel %vm574_vm12, %v1076_v56, %v575_v25  ;;  %v579_v3 = vsel %vm577_vm13, %v578_v4, %v1078_v1  ;;  %v816_v7 = vshll.u32 %v1145_v42, %v804_v22  ;;  %v817_v58 = vshrl.u32 %v1146_v44, %v805_v11 }
  0xbf   :  { %v666_v38 = vxor.u32 2147483648, %v665_v28  ;;  %v1788_v5 = vshrl.u32 %v747_v27, 30  ;;  %v806_v40 = vshrl.u32 %v1142_v36, %v805_v11  ;;  %v819_v23 = vshll.u32 %v1146_v44, %v804_v22 }
  0xc0   :  { %v809_v29 = vor.u32 %v808_v18, %v807_v62  ;;  %v812_v54 = vor.u32 %v811_v63, %v810_v26  ;;  %v815_v20 = vor.u32 %v814_v55, %v813_v57  ;;  %v820_v33 = vshrl.u32 %v1147_v52, %v805_v11  ;;  %v897_v26 = vld [vmem:[#allocation2 + $0x6] sm:$0x3]  ;;  %v898_v63 = vld [vmem:[#allocation2 + $0x8] sm:$0x3] }
  0xc1   :  { %v667_v45 = vsel %vm584_vm3, %v666_v38, %v665_v28  ;;  %v749_v51 = vshll.u32 %v1788_v5, 30  ;;  %v818_v42 = vor.u32 %v817_v58, %v816_v7  ;;  %vm822_vm1 = vcmp.lt.s32.totalorder %v803_v37, 1 }
  0xc2   :  { %v670_v14 = vsel %vm1735_vm8, %v1359_v13, %v667_v45  ;;  %v821_v34 = vor.u32 %v820_v33, %v819_v23  ;;  %vm825_vm2 = vcmp.lt.s32.totalorder %v803_v37, 4  ;;  %v1799_v36 = vsub.s32 0, %v911_v21 }
  0xc3   :  { %vm958_vm4 = vcmask 254976   ;;  %1079 = vcosq.f32 %v670_v14  ;;  %v1801_v44 = vsub.s32 %v746_v9, %v749_v51  ;;  %vm824_vm7 = vcmp.lt.s32.totalorder %v803_v37, 3  ;;  %v896_v9 = vld [vmem:[#allocation2 + $0x4] sm:$0x3] }
  0xc4   :  { %v827_v52 = vsel %vm825_vm2, %v815_v20, 2102212464  ;;  %v580_v31 = vsel %vm573_vm15, %v576_v30, %v579_v3  ;;  %1081 = vsinq.f32 %v670_v14  ;;  %vm823_vm3 = vcmp.lt.s32.totalorder %v803_v37, 2 }
  0xc5   :  { %v830_v46 = vsel %vm822_vm1, %v809_v29, %v812_v54  ;;  %v1807_v2 = vand.u32 3, %v675_v24  ;;  %v752_v56 = vsub.s32 0, %v1801_v44  ;;  %v826_v39 = vsel %vm822_vm1, %v806_v40, %v809_v29  ;;  %v895_v24 = vld [vmem:[#allocation2 + $0x2] sm:$0x3] }
  0xc6   :  { %v831_v59 = vsel %vm825_vm2, %v818_v42, 920167782  ;;  %v828_v41 = vsel %vm824_vm7, %v812_v54, %v827_v52  ;;  %v834_v1 = vsel %vm822_vm1, %v812_v54, %v815_v20  ;;  %v835_v17 = vsel %vm825_vm2, %v821_v34, 1326507024 }
  0xc7   :  { %v832_v22 = vsel %vm824_vm7, %v815_v20, %v831_v59  ;;  %v581_v47 = vsel %vm570_vm0, nan, %v580_v31  ;;  %v1010_v32 = vmin.u32 %v752_v56, %v1801_v44  ;;  %v836_v15 = vsel %vm824_vm7, %v818_v42, %v835_v17  ;;  %v899_v56 = vld [vmem:[#allocation2 + $0xa] sm:$0x3] }
  0xc8   :  { %v833_v8 = vsel %vm823_vm3, %v830_v46, %v832_v22  ;;  %v837_v11 = vsel %vm823_vm3, %v834_v1, %v836_v15  ;;  %v913_v21 = vrot.slane %v1651_v43, %v1799_v36  ;;  %vm677_vm5 = vcmp.lt.s32.totalorder %v1807_v2, 2 }
  0xc9   :  { %v1823_v25 = vmul.u32.u64.low %v1772_v16, %v833_v8  ;;  %v1824_v4 = vmul.u32.u64.high %v1772_v16, %v833_v8, %v1823_v25  ;;  %vm681_vm8 = vcmp.eq.s32.totalorder %v1807_v2, 2  ;;  %v754_v12 = vclz %v1010_v32 }
  0xca   :  { %v829_v19 = vsel %vm823_vm3, %v826_v39, %v828_v41  ;;  %v1833_v62 = vmul.u32.u64.low %v1772_v16, %v837_v11  ;;  %v1834_v18 = vmul.u32.u64.high %v1772_v16, %v837_v11, %v1833_v62  ;;  %v917_v57 = vrot.slane %v1686_v48, %v1799_v36 }
  0xcb   :  { %v921_v43 = vrot.slane %v1690_v53, %v1799_v36  ;;  %v1011_v28 = vadd.s32 4294967294, %v754_v12  ;;  %v925_v27 = vrot.slane %v1762_v61, %v1799_v36  ;;  %v929_v37 = vrot.slane %v581_v47, %v1799_v36 }
  0xcc   :  { %v950_v55 = vadd.f32 %v913_v21, %v894_v35  ;;  %v742_v30 = vadd.s32 %v1748_v6, %v1745_v50  ;;  %v848_v3 = vadd.s32 1, %v1824_v4  ;;  %v951_v7 = vadd.f32 %v917_v57, %v895_v24 }
  0xcd   :  { %v952_v58 = vadd.f32 %v921_v43, %v896_v9  ;;  %v1080_v38 = vpop.eup %1079  ;;  %vm1012_vm6 = vcmp.lt.s32.totalorder %v1011_v28, 0  ;;  %v845_v48 = vmul.u32 %v1772_v16, %v829_v19  ;;  %v953_v40 = vadd.f32 %v925_v27, %v897_v26 }
  0xce   :  { %v954_v53 = vadd.f32 %v929_v37, %v898_v63  ;;  %959 = vst.msk [vmem:[#allocation5] sm:$0x3] %vm958_vm4, %v950_v55  ;;  %v1082_v23 = vpop.eup %1081  ;;  %vm678_vm9 = vcmp.eq.s32.totalorder %v1807_v2, 0  ;;  %v682_v61 = vxor.u32 2147483648, %v1080_v38  ;;  %v757_v29 = vsel %vm1012_vm6, 0, %v1011_v28 }
  0xcf   :  { %vm847_vm10 = vc.u32 %v1834_v18, %v1823_v25  ;;  %960 = vst.msk [vmem:[#allocation5 + $0x2] sm:$0x3] %vm958_vm4, %v951_v7  ;;  %961 = vst.msk [vmem:[#allocation5 + $0x4] sm:$0x3] %vm958_vm4, %v952_v58  ;;  %v679_v50 = vxor.u32 2147483648, %v1082_v23  ;;  %v758_v6 = vsub.s32 32, %v757_v29  ;;  %v759_v16 = vshll.u32 %v1801_v44, %v757_v29 }
  0xd0   :  { %v762_v54 = vsub.s32 4294967266, %v757_v29  ;;  %962 = vst.msk [vmem:[#allocation5 + $0x6] sm:$0x3] %vm958_vm4, %v953_v40  ;;  %963 = vst.msk [vmem:[#allocation5 + $0x8] sm:$0x3] %vm958_vm4, %v954_v53  ;;  %vm674_vm11 = vweird.f32 %v1359_v13  ;;  %v683_v20 = vsel %vm681_vm8, %v682_v61, %v1082_v23  ;;  %v849_v33 = vsel %vm847_vm10, %v848_v3, %v1824_v4 }
  0xd1   :  { %v680_v45 = vsel %vm678_vm9, %v1080_v38, %v679_v50  ;;  %v760_v51 = vshrl.u32 %v742_v30, %v758_v6  ;;  %v850_v14 = vadd.s32 %v849_v33, %v845_v48  ;;  %v772_v17 = vsub.s32 4, %v1788_v5  ;;  %v900_v29 = vld [vmem:[#allocation2 + $0xc] sm:$0x3] }
  0xd2   :  { %v763_v42 = vadd.s32 127, %v762_v54  ;;  %v684_v34 = vsel %vm677_vm5, %v680_v45, %v683_v20  ;;  %vm688_vm12 = vcmp.lt.s32.totalorder %v1362_v0, 0  ;;  %vm687_vm13 = vcmp.le.f32.partialorder %v686_v49, 0.7853982 }
  0xd3   :  { %v685_v44 = vsel %vm674_vm11, nan, %v684_v34  ;;  %v761_v52 = vor.u32 %v760_v51, %v759_v16  ;;  %v851_v46 = vadd.s32 536870912, %v850_v14  ;;  %v773_v15 = vsel %vm688_vm12, %v772_v17, %v1788_v5 }
  0xd4   :  { %v764_v31 = vshll.u32 %v763_v42, 23  ;;  %v933_v39 = vrot.slane %v685_v44, %v1799_v36  ;;  %v775_v12 = vsel %vm687_vm13, 0, %v773_v15  ;;  %v846_v62 = vadd.s32 %v1823_v25, %v1834_v18 }
  0xd5   :  { %v768_v59 = vcvt.s32.f32 %v761_v52  ;;  %v852_v41 = vshrl.u32 %v851_v46, 30  ;;  %v779_v24 = vadd.s32 3, %v775_v12  ;;  %vm778_vm2 = vweird.f32 %v1362_v0 }
  0xd6   :  { %v765_v13 = vor.u32 4788187, %v764_v31  ;;  %v955_v22 = vadd.f32 %v933_v39, %v899_v56  ;;  %vm792_vm7 = vcmp.lt.s32.totalorder %v1454_v10, 0  ;;  %vm791_vm3 = vcmp.le.f32.partialorder %v790_v60, 0.7853982 }
  0xd7   :  { %v853_v47 = vshll.u32 %v852_v41, 30  ;;  %v780_v49 = vand.u32 3, %v779_v24  ;;  %v876_v40 = vsub.s32 4, %v852_v41  ;;  %vm882_vm9 = vweird.f32 %v1454_v10  ;;  %v901_v56 = vld [vmem:[#allocation2 + $0xe] sm:$0x3] }
  0xd8   :  { %v766_v1 = vand.u32 2147483647, %v765_v13  ;;  %964 = vst.msk [vmem:[#allocation5 + $0xa] sm:$0x3] %vm958_vm4, %v955_v22 }
  0xd9   :  { %v854_v2 = vsub.s32 %v850_v14, %v853_v47  ;;  %vm785_vm15 = vcmp.eq.s32.totalorder %v780_v49, 2  ;;  %vm782_vm0 = vcmp.eq.s32.totalorder %v780_v49, 0  ;;  %vm781_vm1 = vcmp.lt.s32.totalorder %v780_v49, 2 }
  0xda   :  { %v769_v32 = vmul.f32 %v768_v59, %v766_v1  ;;  %v877_v16 = vsel %vm792_vm7, %v876_v40, %v852_v41 }
  0xdb   :  { %v856_v11 = vsub.s32 0, %v854_v2  ;;  %v879_v33 = vsel %vm791_vm3, 0, %v877_v16 }
  0xdc   :  { %v770_v8 = vxor.u32 2147483648, %v769_v32  ;;  %v883_v45 = vadd.s32 3, %v879_v33 }
  0xdd   :  { %v1014_v35 = vmin.u32 %v856_v11, %v854_v2 }
  0xde   :  { %v771_v4 = vsel %vm688_vm12, %v770_v8, %v769_v32  ;;  %v884_v51 = vand.u32 3, %v883_v45 }
  0xdf   :  { %v774_v21 = vsel %vm687_vm13, %v1362_v0, %v771_v4  ;;  %v858_v19 = vclz %v1014_v35 }
  0xe0   :  { %1083 = vcosq.f32 %v774_v21  ;;  %vm889_vm5 = vcmp.eq.s32.totalorder %v884_v51, 2  ;;  %vm886_vm8 = vcmp.eq.s32.totalorder %v884_v51, 0  ;;  %vm885_vm6 = vcmp.lt.s32.totalorder %v884_v51, 2 }
  0xe1   :  { %1085 = vsinq.f32 %v774_v21  ;;  %v1015_v9 = vadd.s32 4294967294, %v858_v19 }
  0xe3   :  { %vm1016_vm14 = vcmp.lt.s32.totalorder %v1015_v9, 0 }
  0xe4   :  { %v861_v26 = vsel %vm1016_vm14, 0, %v1015_v9 }
  0xe5   :  { %v862_v63 = vsub.s32 32, %v861_v26  ;;  %v863_v57 = vshll.u32 %v854_v2, %v861_v26  ;;  %v866_v5 = vsub.s32 4294967266, %v861_v26 }
  0xe7   :  { %v864_v43 = vshrl.u32 %v846_v62, %v862_v63  ;;  %v867_v28 = vadd.s32 127, %v866_v5 }
  0xe9   :  { %v865_v37 = vor.u32 %v864_v43, %v863_v57  ;;  %v868_v55 = vshll.u32 %v867_v28, 23 }
  0xea   :  { %v1084_v27 = vpop.eup %1083 }
  0xeb   :  { %v1086_v30 = vpop.eup %1085  ;;  %v786_v3 = vxor.u32 2147483648, %v1084_v27  ;;  %v869_v58 = vor.u32 4788187, %v868_v55  ;;  %v872_v38 = vcvt.s32.f32 %v865_v37 }
  0xec   :  { %v783_v7 = vxor.u32 2147483648, %v1086_v30 }
  0xed   :  { %v787_v25 = vsel %vm785_vm15, %v786_v3, %v1086_v30  ;;  %v870_v48 = vand.u32 2147483647, %v869_v58 }
  0xee   :  { %v784_v18 = vsel %vm782_vm0, %v1084_v27, %v783_v7 }
  0xef   :  { %v788_v53 = vsel %vm781_vm1, %v784_v18, %v787_v25  ;;  %v873_v61 = vmul.f32 %v872_v38, %v870_v48 }
  0xf0   :  { %v789_v23 = vsel %vm778_vm2, nan, %v788_v53 }
  0xf1   :  { %v937_v50 = vrot.slane %v789_v23, %v1799_v36  ;;  %v874_v6 = vxor.u32 2147483648, %v873_v61 }
  0xf3   :  { %v956_v54 = vadd.f32 %v937_v50, %v900_v29  ;;  %v875_v20 = vsel %vm792_vm7, %v874_v6, %v873_v61 }
  0xf4   :  { %v878_v0 = vsel %vm791_vm3, %v1454_v10, %v875_v20 }
  0xf5   :  { %965 = vst.msk [vmem:[#allocation5 + $0xc] sm:$0x3] %vm958_vm4, %v956_v54  ;;  %1087 = vcosq.f32 %v878_v0 }
  0xf6   :  { %1089 = vsinq.f32 %v878_v0 }
  0xff   :  { %v1088_v42 = vpop.eup %1087 }
 0x100   :  { %v1090_v14 = vpop.eup %1089  ;;  %v890_v34 = vxor.u32 2147483648, %v1088_v42 }
 0x101   :  { %v887_v60 = vxor.u32 2147483648, %v1090_v14 }
 0x102   :  { %v891_v44 = vsel %vm889_vm5, %v890_v34, %v1090_v14 }
 0x103   :  { %v888_v52 = vsel %vm886_vm8, %v1088_v42, %v887_v60 }
 0x104   :  { %v892_v31 = vsel %vm885_vm6, %v888_v52, %v891_v44 }
 0x105   :  { %v893_v46 = vsel %vm882_vm9, nan, %v892_v31 }
 0x106   :  { %v941_v39 = vrot.slane %v893_v46, %v1799_v36 }
 0x108   :  { %v957_v13 = vadd.f32 %v941_v39, %v901_v56 }
 0x10a   :  { %966 = vst.msk [vmem:[#allocation5 + $0xe] sm:$0x3] %vm958_vm4, %v957_v13 }
 0x10b   :  { %1124 = shalt.err (!%p1121_p12)
}
 0x10c   :  { %s1125_s30 = scalar_lea.hbm %s1899_s2, 256 }
 0x10d   :  { %p1126_p13 = scmp.ne.s32.totalorder %s1899_s2, %s1125_s30  ;;  %p1129_p0 = scmp.lt.u32.totalorder %s1125_s30, %s1899_s2 }
 0x10f   :  { %p1131_p1 = pnand %p1129_p0, %p1126_p13 }
 0x111   :  { %1134 = shalt.err (!%p1131_p1)
}
 0x112   :  { %978 = dma.vmem_to_hbm [thread:$0]  %s973_s1, 256, %s1899_s2, [#allocation4], %s1140_s19, %s1140_s19, %s1141_s20  }
 0x113   :  { %1137 = dma.done.wait [#allocation4], 256  }
 0x114   :  { %1138 = vsyncadd [#allocation4], 4294967040 }
 0x115   :  { %982 = vsyncpa [#allocation3], 1 }
 0x116   :  { %983 = vsyncpa [#allocation4], 1 }

</bundles_post_ra>
